<compile_context>
chip_gen: v5e
topology: v5e:2x2
jax: 0.10.0
libtpu: 0.0.40
codegen_flags: <defaults>
</compile_context>

<pallas_src>
import functools

import jax
import jax.numpy as jnp
from jax import lax
from jax.experimental import pallas as pl
from jax.experimental.pallas import tpu as pltpu

LANE = 128        # vreg lane width: feature dims padded to a multiple of this
SUBLANE = 8       # vreg sublane width: node dim padded to a multiple of this
TILE = 256        # row / reduction tile for the tiled (large-graph) path


def _round_up(v, m):
    return (v + m - 1) // m * m


# ----------------------------------------------------------------------------
# Pallas kernels
# ----------------------------------------------------------------------------
def _make_fused_forward_kernel(num_layers, f_valid):
    """Whole forward (all ARMAConv layers + ReLU + masked log_softmax) fused
    into one kernel for graphs that fit VMEM."""

    def kernel(*refs):
        x_ref = refs[0]
        a_refs = refs[1:1 + num_layers]
        w_refs = refs[1 + num_layers:1 + 2 * num_layers]
        b_refs = refs[1 + 2 * num_layers:1 + 3 * num_layers]
        o_ref = refs[1 + 3 * num_layers]

        x = x_ref[...]                                    # f32 [Np, Fp_in]
        for l in range(num_layers):
            w_cat = w_refs[l][...]                        # bf16 [Fp_in, 2*Fp_out]
            f_out = w_cat.shape[1] // 2
            # single MXU pass for both weight paths: X @ [W_init | W_root]
            xw = jnp.dot(x.astype(jnp.bfloat16), w_cat,
                         preferred_element_type=jnp.float32)
            h = xw[:, :f_out]                             # X @ W_init
            r = xw[:, f_out:]                             # X @ W_root (skip path)
            # TODO(synk): skip path uses dropout(x) in training; identity in eval.
            p = jnp.dot(a_refs[l][...], h.astype(jnp.bfloat16),
                        preferred_element_type=jnp.float32)   # A_hat @ (X W_init)
            # f32 epilogue (v5e has no bf16 VPU path); ReLU = ARMAConv act,
            # the inter-layer F.relu is idempotent so it is already covered.
            x = jnp.maximum(p + r + b_refs[l][...], 0.0)

        # masked log_softmax over the valid (unpadded) feature columns
        col = lax.broadcasted_iota(jnp.int32, x.shape, 1)
        valid = col < f_valid
        xm = jnp.where(valid, x, -1e30)
        m = jnp.max(xm, axis=-1, keepdims=True)
        s = xm - m
        e = jnp.where(valid, jnp.exp(s), 0.0)
        lse = jnp.log(jnp.sum(e, axis=-1, keepdims=True))
        o_ref[...] = s - lse

    return kernel


def _xw_kernel(x_ref, w_ref, o_ref):
    """Row-tiled X @ [W_init | W_root] (both weight paths in one MXU pass)."""
    o_ref[...] = jnp.dot(x_ref[...].astype(jnp.bfloat16), w_ref[...],
                         preferred_element_type=jnp.float32)


def _prop_kernel(a_ref, h_ref, r_ref, b_ref, o_ref, acc_ref):
    """Tiled A_hat @ H with f32 scratch accumulator; fused skip+bias+ReLU epilogue."""
    @pl.when(pl.program_id(1) == 0)
    def _():
        acc_ref[...] = jnp.zeros_like(acc_ref)

    acc_ref[...] += jnp.dot(a_ref[...], h_ref[...].astype(jnp.bfloat16),
                            preferred_element_type=jnp.float32)

    @pl.when(pl.program_id(1) == pl.num_programs(1) - 1)
    def _():
        o_ref[...] = jnp.maximum(acc_ref[...] + r_ref[...] + b_ref[...], 0.0)


def _make_log_softmax_kernel(f_valid):
    def kernel(x_ref, o_ref):
        x = x_ref[...]
        col = lax.broadcasted_iota(jnp.int32, x.shape, 1)
        valid = col < f_valid
        xm = jnp.where(valid, x, -1e30)
        m = jnp.max(xm, axis=-1, keepdims=True)
        s = xm - m
        e = jnp.where(valid, jnp.exp(s), 0.0)
        lse = jnp.log(jnp.sum(e, axis=-1, keepdims=True))
        o_ref[...] = s - lse
    return kernel


# ----------------------------------------------------------------------------
# pallas_call wrappers
# ----------------------------------------------------------------------------
def _full_spec(arr):
    ndim = arr.ndim
    return pl.BlockSpec(arr.shape, lambda i, _n=ndim: (0,) * _n)


def arma_forward_fused(x_p, a_list, w_list, b_list, f_valid):
    n_pad = x_p.shape[0]
    f_pad = w_list[-1].shape[1] // 2
    num_layers = len(a_list)
    operands = [x_p, *a_list, *w_list, *b_list]

    flops = 0
    for a, w in zip(a_list, w_list):
        flops += 2 * n_pad * w.shape[0] * w.shape[1]              # X @ [Wi|Wr]
        flops += 2 * a.shape[0] * a.shape[1] * (w.shape[1] // 2)  # A_hat @ H
    bytes_accessed = sum(int(v.size) * v.dtype.itemsize for v in operands)
    bytes_accessed += n_pad * f_pad * 4                            # output

    return pl.pallas_call(
        _make_fused_forward_kernel(num_layers, f_valid),
        out_shape=jax.ShapeDtypeStruct((n_pad, f_pad), jnp.float32),
        grid=(1,),
        in_specs=[_full_spec(v) for v in operands],
        out_specs=pl.BlockSpec((n_pad, f_pad), lambda i: (0, 0)),
        compiler_params=pltpu.CompilerParams(
            dimension_semantics=("arbitrary",),
            # conservative explicit limit; safe on v5e/v6e (128 MiB) and v7x (64 MiB)
            vmem_limit_bytes=32 * 1024 * 1024),
        cost_estimate=pl.CostEstimate(flops=int(flops),
                                      transcendentals=int(n_pad * f_pad),
                                      bytes_accessed=int(bytes_accessed)),
    )(*operands)


def xw_matmul(x, w_cat, tm):
    n, fi = x.shape
    fo2 = w_cat.shape[1]
    return pl.pallas_call(
        _xw_kernel,
        out_shape=jax.ShapeDtypeStruct((n, fo2), jnp.float32),
        grid=(n // tm,),
        in_specs=[pl.BlockSpec((tm, fi), lambda i: (i, 0)),
                  pl.BlockSpec((fi, fo2), lambda i: (0, 0))],
        out_specs=pl.BlockSpec((tm, fo2), lambda i: (i, 0)),
        compiler_params=pltpu.CompilerParams(
            dimension_semantics=("parallel",),
            vmem_limit_bytes=32 * 1024 * 1024),
    )(x, w_cat)


def arma_propagate(a, xw, bias, tm, tk):
    n = a.shape[0]
    f = xw.shape[1] // 2
    flops = 2 * n * n * f
    bytes_accessed = int(a.size) * 2 + (n // tm) * n * f * 4 + 2 * n * f * 4
    return pl.pallas_call(
        _prop_kernel,
        out_shape=jax.ShapeDtypeStruct((n, f), jnp.float32),
        grid=(n // tm, n // tk),
        in_specs=[
            pl.BlockSpec((tm, tk), lambda i, k: (i, k)),   # A_hat tile (bf16)
            pl.BlockSpec((tk, f), lambda i, k: (k, 0)),    # H = XW[:, :f], rows k
            pl.BlockSpec((tm, f), lambda i, k: (i, 1)),    # R = XW[:, f:], rows i
            pl.BlockSpec((1, f), lambda i, k: (0, 0)),     # bias
        ],
        out_specs=pl.BlockSpec((tm, f), lambda i, k: (i, 0)),
        scratch_shapes=[pltpu.VMEM((tm, f), jnp.float32)],
        compiler_params=pltpu.CompilerParams(
            dimension_semantics=("parallel", "arbitrary"),
            vmem_limit_bytes=32 * 1024 * 1024),
        cost_estimate=pl.CostEstimate(flops=int(flops), transcendentals=0,
                                      bytes_accessed=int(bytes_accessed)),
    )(a, xw, xw, bias)


def log_softmax_tiled(x, f_valid, tm):
    n, f = x.shape
    return pl.pallas_call(
        _make_log_softmax_kernel(f_valid),
        out_shape=jax.ShapeDtypeStruct((n, f), jnp.float32),
        grid=(n // tm,),
        in_specs=[pl.BlockSpec((tm, f), lambda i: (i, 0))],
        out_specs=pl.BlockSpec((tm, f), lambda i: (i, 0)),
        compiler_params=pltpu.CompilerParams(dimension_semantics=("parallel",)),
    )(x)


def arma_forward_tiled(x_p, a_list, w_list, b_list, f_valid, tm, tk):
    x = x_p
    for a, w_cat, b in zip(a_list, w_list, b_list):
        xw = xw_matmul(x, w_cat, tm)
        x = arma_propagate(a, xw, b, tm, tk)
        # inter-layer F.relu already applied (idempotent); eval dropout = identity.
    return log_softmax_tiled(x, f_valid, tm)


# ----------------------------------------------------------------------------
# JAX glue: gcn_norm densification, parameter packing / padding, dispatch
# ----------------------------------------------------------------------------
def gcn_norm_dense(edge_index, num_nodes, n_pad):
    """PyG gcn_norm (symmetric, add_self_loops=False) densified to [n_pad, n_pad]."""
    row, col = edge_index[0], edge_index[1]                 # source, target
    w = jnp.ones(row.shape[0], jnp.float32)
    deg = jnp.zeros((num_nodes,), jnp.float32).at[col].add(w)
    dinv = jnp.where(deg > 0, lax.rsqrt(jnp.maximum(deg, 1e-12)), 0.0)
    norm = dinv[row] * w * dinv[col]
    return jnp.zeros((n_pad, n_pad), jnp.float32).at[col, row].add(norm)


def glorot(key, shape):
    fan_in, fan_out = shape
    limit = jnp.sqrt(6.0 / (fan_in + fan_out))
    return jax.random.uniform(key, shape, jnp.float32, -limit, limit)


def init_arma_params(key, in_channels, hidden_channels, num_layers):
    """Shapes match ARMAConv(K=1, T=1): init_weight/root_weight [F_in, F_out],
    bias [1, F_out]. (`init_weights` only touches nn.Linear -> no-op here.)"""
    dims = [(in_channels, hidden_channels)]
    dims += [(hidden_channels, hidden_channels)] * (num_layers - 1)
    params = []
    for fi, fo in dims:
        key, k1, k2 = jax.random.split(key, 3)
        params.append(dict(w_init=glorot(k1, (fi, fo)),
                           w_root=glorot(k2, (fi, fo)),
                           bias=jnp.zeros((1, fo), jnp.float32)))
    return params


def _pack_layer(p):
    fi, fo = p["w_init"].shape
    fip, fop = _round_up(fi, LANE), _round_up(fo, LANE)
    wi = jnp.zeros((fip, fop), jnp.float32).at[:fi, :fo].set(p["w_init"])
    wr = jnp.zeros((fip, fop), jnp.float32).at[:fi, :fo].set(p["w_root"])
    w_cat = jnp.concatenate([wi, wr], axis=1).astype(jnp.bfloat16)   # [fip, 2*fop]
    b = jnp.zeros((1, fop), jnp.float32).at[:, :fo].set(p["bias"])
    return w_cat, b


def _prepare(x, edge_indices, params, row_multiple):
    n, fi = x.shape
    n_pad = _round_up(n, row_multiple)
    fi_pad = _round_up(fi, LANE)
    x_p = jnp.zeros((n_pad, fi_pad), jnp.float32).at[:n, :fi].set(
        x.astype(jnp.float32))
    a_list = [gcn_norm_dense(ei, n, n_pad).astype(jnp.bfloat16)
              for ei in edge_indices]
    packed = [_pack_layer(p) for p in params]
    w_list = [w for w, _ in packed]
    b_list = [b for _, b in packed]
    f_valid = params[-1]["w_init"].shape[1]
    return x_p, a_list, w_list, b_list, f_valid


@functools.partial(jax.jit, static_argnames=("mode",))
def arma_forward(x, edge_indices, params, mode="auto"):
    n = x.shape[0]
    num_layers = len(edge_indices)
    n8 = _round_up(n, SUBLANE)
    a_resident_bytes = num_layers * n8 * n8 * 2                 # bf16 A_hat stack
    use_fused = (mode == "fused") or (
        mode == "auto" and a_resident_bytes <= 4 * 1024 * 1024 and n8 <= 2048)
    if use_fused:
        x_p, a_list, w_list, b_list, f_valid = _prepare(
            x, edge_indices, params, SUBLANE)
        out = arma_forward_fused(x_p, a_list, w_list, b_list, f_valid)
    else:
        x_p, a_list, w_list, b_list, f_valid = _prepare(
            x, edge_indices, params, TILE)
        out = arma_forward_tiled(x_p, a_list, w_list, b_list, f_valid,
                                 tm=TILE, tk=TILE)
    return out[:n, :f_valid]


# ----------------------------------------------------------------------------
# Pure-JAX reference (for correctness checks)
# ----------------------------------------------------------------------------
def arma_forward_ref(x, edge_indices, params, bf16=False):
    cast = (lambda v: v.astype(jnp.bfloat16)) if bf16 else (lambda v: v)
    x = x.astype(jnp.float32)
    n = x.shape[0]
    num_layers = len(edge_indices)
    for i, ei in enumerate(edge_indices):
        p = params[i]
        a = cast(gcn_norm_dense(ei, n, n))
        h = jnp.dot(cast(x), cast(p["w_init"]), preferred_element_type=jnp.float32)
        if bf16:
            h = h.astype(jnp.bfloat16)
        prop = jnp.dot(a, h, preferred_element_type=jnp.float32)
        r = jnp.dot(cast(x), cast(p["w_root"]), preferred_element_type=jnp.float32)
        x = jnp.maximum(prop + r + p["bias"], 0.0)
        if i != num_layers - 1:
            x = jnp.maximum(x, 0.0)       # F.relu (idempotent); dropout eval = id
    return jax.nn.log_softmax(x, axis=-1)


# ----------------------------------------------------------------------------
# Driver
# ----------------------------------------------------------------------------
if __name__ == "__main__":
    def make_case(key, num_nodes, in_channels, hidden_channels, num_layers, num_edges):
        kx, kp, ke = jax.random.split(key, 3)
        x = jax.random.normal(kx, (num_nodes, in_channels), jnp.float32)
        params = init_arma_params(kp, in_channels, hidden_channels, num_layers)
        edge_indices = []
        for kk in jax.random.split(ke, num_layers):
            ks, kt = jax.random.split(kk)
            src = jax.random.randint(ks, (num_edges,), 0, num_nodes, jnp.int32)
            dst = jax.random.randint(kt, (num_edges,), 0, num_nodes, jnp.int32)
            edge_indices.append(jnp.stack([src, dst], axis=0))
        return x, edge_indices, params

    key = jax.random.PRNGKey(0)
    k_small, k_large = jax.random.split(key)

    # --- small case: fully fused single-pallas_call path ---------------------
    x, eis, params = make_case(k_small, 16, 8, 16, 2, 48)
    out = jax.block_until_ready(arma_forward(x, eis, params))
    assert out.shape == (16, 16)
    assert bool(jnp.allclose(jnp.sum(jnp.exp(out), axis=-1), 1.0, atol=1e-3))
    ref_bf16 = arma_forward_ref(x, eis, params, bf16=True)
    ref_f32 = arma_forward_ref(x, eis, params, bf16=False)
    assert bool(jnp.allclose(out, ref_bf16, atol=1e-2, rtol=1e-2))
    assert bool(jnp.allclose(out, ref_f32, atol=5e-2, rtol=5e-2))

    # --- larger case: tiled / pipelined (accumulator) path -------------------
    x, eis, params = make_case(k_large, 512, 64, 128, 2, 4096)
    out = jax.block_until_ready(arma_forward(x, eis, params, mode="tiled"))
    assert out.shape == (512, 128)
    assert bool(jnp.allclose(jnp.sum(jnp.exp(out), axis=-1), 1.0, atol=1e-3))
    ref_bf16 = arma_forward_ref(x, eis, params, bf16=True)
    ref_f32 = arma_forward_ref(x, eis, params, bf16=False)
    assert bool(jnp.allclose(out, ref_bf16, atol=1e-2, rtol=1e-2))
    assert bool(jnp.allclose(out, ref_f32, atol=0.35, rtol=0.25))

    print("KERNEL_OK")
</pallas_src>

<mosaic_0001>
module attributes {stable_mosaic.version = 11 : i64} {
  func.func @kernel(%arg0: i32, %arg1: memref<16x128xf32, #tpu.memory_space<vmem>>, %arg2: memref<16x16xbf16, #tpu.memory_space<vmem>>, %arg3: memref<16x16xbf16, #tpu.memory_space<vmem>>, %arg4: memref<128x256xbf16, #tpu.memory_space<vmem>>, %arg5: memref<128x256xbf16, #tpu.memory_space<vmem>>, %arg6: memref<1x128xf32, #tpu.memory_space<vmem>>, %arg7: memref<1x128xf32, #tpu.memory_space<vmem>>, %arg8: memref<16x128xf32, #tpu.memory_space<vmem>>) attributes {dimension_semantics = [#tpu.dimension_semantics<arbitrary>], iteration_bounds = array<i64: 1>, scalar_prefetch = 0 : i64, scratch_operands = 0 : i64, tpu.core_type = #tpu.core_type<tc>, window_params = [{pipeline_mode = #tpu.pipeline_mode<synchronous>, transform_indices = @transform_0, window_bounds = array<i64: 16, 128>}, {pipeline_mode = #tpu.pipeline_mode<synchronous>, transform_indices = @transform_1, window_bounds = array<i64: 16, 16>}, {pipeline_mode = #tpu.pipeline_mode<synchronous>, transform_indices = @transform_2, window_bounds = array<i64: 16, 16>}, {pipeline_mode = #tpu.pipeline_mode<synchronous>, transform_indices = @transform_3, window_bounds = array<i64: 128, 256>}, {pipeline_mode = #tpu.pipeline_mode<synchronous>, transform_indices = @transform_4, window_bounds = array<i64: 128, 256>}, {pipeline_mode = #tpu.pipeline_mode<synchronous>, transform_indices = @transform_5, window_bounds = array<i64: 1, 128>}, {pipeline_mode = #tpu.pipeline_mode<synchronous>, transform_indices = @transform_6, window_bounds = array<i64: 1, 128>}, {pipeline_mode = #tpu.pipeline_mode<synchronous>, transform_indices = @transform_7, window_bounds = array<i64: 16, 128>}]} {
    %c0 = arith.constant 0 : index
    %c0_0 = arith.constant 0 : index
    %0 = vector.load %arg1[%c0, %c0_0] : memref<16x128xf32, #tpu.memory_space<vmem>>, vector<16x128xf32>
    %c0_1 = arith.constant 0 : index
    %c0_2 = arith.constant 0 : index
    %1 = vector.load %arg4[%c0_1, %c0_2] : memref<128x256xbf16, #tpu.memory_space<vmem>>, vector<128x256xbf16>
    %2 = arith.truncf %0 : vector<16x128xf32> to vector<16x128xbf16>
    %cst = arith.constant dense<0.000000e+00> : vector<16x256xf32>
    %3 = tpu.matmul %2, %1, %cst {dimension_numbers = #tpu.dot_dimension_numbers<[1], [0], [0], [1], [0, 0, 1, 1], [], []>} : vector<16x128xbf16>, vector<128x256xbf16>, vector<16x256xf32> -> vector<16x256xf32>
    %4 = vector.extract_strided_slice %3 {offsets = [0, 0], sizes = [16, 128], strides = [1, 1]} : vector<16x256xf32> to vector<16x128xf32>
    %5 = vector.extract_strided_slice %3 {offsets = [0, 128], sizes = [16, 128], strides = [1, 1]} : vector<16x256xf32> to vector<16x128xf32>
    %c0_3 = arith.constant 0 : index
    %c0_4 = arith.constant 0 : index
    %6 = vector.load %arg2[%c0_3, %c0_4] : memref<16x16xbf16, #tpu.memory_space<vmem>>, vector<16x16xbf16>
    %7 = arith.truncf %4 : vector<16x128xf32> to vector<16x128xbf16>
    %cst_5 = arith.constant dense<0.000000e+00> : vector<16x128xf32>
    %8 = tpu.matmul %6, %7, %cst_5 {dimension_numbers = #tpu.dot_dimension_numbers<[1], [0], [0], [1], [0, 0, 1, 1], [], []>} : vector<16x16xbf16>, vector<16x128xbf16>, vector<16x128xf32> -> vector<16x128xf32>
    %9 = arith.addf %8, %5 : vector<16x128xf32>
    %c0_6 = arith.constant 0 : index
    %c0_7 = arith.constant 0 : index
    %10 = vector.load %arg6[%c0_6, %c0_7] : memref<1x128xf32, #tpu.memory_space<vmem>>, vector<1x128xf32>
    %11 = vector.broadcast %10 : vector<1x128xf32> to vector<16x128xf32>
    %12 = arith.addf %9, %11 : vector<16x128xf32>
    %cst_8 = arith.constant 0.000000e+00 : f32
    %13 = vector.broadcast %cst_8 : f32 to vector<16x128xf32>
    %14 = arith.maximumf %12, %13 : vector<16x128xf32>
    %c0_9 = arith.constant 0 : index
    %c0_10 = arith.constant 0 : index
    %15 = vector.load %arg5[%c0_9, %c0_10] : memref<128x256xbf16, #tpu.memory_space<vmem>>, vector<128x256xbf16>
    %16 = arith.truncf %14 : vector<16x128xf32> to vector<16x128xbf16>
    %cst_11 = arith.constant dense<0.000000e+00> : vector<16x256xf32>
    %17 = tpu.matmul %16, %15, %cst_11 {dimension_numbers = #tpu.dot_dimension_numbers<[1], [0], [0], [1], [0, 0, 1, 1], [], []>} : vector<16x128xbf16>, vector<128x256xbf16>, vector<16x256xf32> -> vector<16x256xf32>
    %18 = vector.extract_strided_slice %17 {offsets = [0, 0], sizes = [16, 128], strides = [1, 1]} : vector<16x256xf32> to vector<16x128xf32>
    %19 = vector.extract_strided_slice %17 {offsets = [0, 128], sizes = [16, 128], strides = [1, 1]} : vector<16x256xf32> to vector<16x128xf32>
    %c0_12 = arith.constant 0 : index
    %c0_13 = arith.constant 0 : index
    %20 = vector.load %arg3[%c0_12, %c0_13] : memref<16x16xbf16, #tpu.memory_space<vmem>>, vector<16x16xbf16>
    %21 = arith.truncf %18 : vector<16x128xf32> to vector<16x128xbf16>
    %cst_14 = arith.constant dense<0.000000e+00> : vector<16x128xf32>
    %22 = tpu.matmul %20, %21, %cst_14 {dimension_numbers = #tpu.dot_dimension_numbers<[1], [0], [0], [1], [0, 0, 1, 1], [], []>} : vector<16x16xbf16>, vector<16x128xbf16>, vector<16x128xf32> -> vector<16x128xf32>
    %23 = arith.addf %22, %19 : vector<16x128xf32>
    %c0_15 = arith.constant 0 : index
    %c0_16 = arith.constant 0 : index
    %24 = vector.load %arg7[%c0_15, %c0_16] : memref<1x128xf32, #tpu.memory_space<vmem>>, vector<1x128xf32>
    %25 = vector.broadcast %24 : vector<1x128xf32> to vector<16x128xf32>
    %26 = arith.addf %23, %25 : vector<16x128xf32>
    %cst_17 = arith.constant 0.000000e+00 : f32
    %27 = vector.broadcast %cst_17 : f32 to vector<16x128xf32>
    %28 = arith.maximumf %26, %27 : vector<16x128xf32>
    %29 = tpu.iota {dimensions = array<i32: 1>} : vector<16x128xi32>
    %c16_i32 = arith.constant 16 : i32
    %30 = vector.broadcast %c16_i32 : i32 to vector<16x128xi32>
    %31 = arith.cmpi slt, %29, %30 : vector<16x128xi32>
    %cst_18 = arith.constant -1.000000e+30 : f32
    %32 = vector.broadcast %cst_18 : f32 to vector<16x128xf32>
    %33 = arith.select %31, %28, %32 : vector<16x128xi1>, vector<16x128xf32>
    %cst_19 = arith.constant dense<0xFF800000> : vector<16xf32>
    %34 = vector.multi_reduction <maximumf>, %33, %cst_19 [1] : vector<16x128xf32> to vector<16xf32>
    %35 = vector.shape_cast %34 : vector<16xf32> to vector<16x1xf32>
    %36 = vector.broadcast %35 : vector<16x1xf32> to vector<16x128xf32>
    %37 = arith.subf %33, %36 : vector<16x128xf32>
    %38 = math.exp %37 : vector<16x128xf32>
    %cst_20 = arith.constant 0.000000e+00 : f32
    %39 = vector.broadcast %cst_20 : f32 to vector<16x128xf32>
    %40 = arith.select %31, %38, %39 : vector<16x128xi1>, vector<16x128xf32>
    %cst_21 = arith.constant dense<0.000000e+00> : vector<16xf32>
    %41 = vector.multi_reduction <add>, %40, %cst_21 [1] : vector<16x128xf32> to vector<16xf32>
    %42 = vector.shape_cast %41 : vector<16xf32> to vector<16x1xf32>
    %43 = math.log %42 : vector<16x1xf32>
    %44 = vector.broadcast %43 : vector<16x1xf32> to vector<16x128xf32>
    %45 = arith.subf %37, %44 : vector<16x128xf32>
    %c0_22 = arith.constant 0 : index
    %c0_23 = arith.constant 0 : index
    %46 = vector.load %arg8[%c0_22, %c0_23] : memref<16x128xf32, #tpu.memory_space<vmem>>, vector<16x128xf32>
    tpu.vector_store %arg8[%c0_22, %c0_23], %45 {strides = array<i32>} : memref<16x128xf32, #tpu.memory_space<vmem>>, vector<16x128xf32>,
    return
  }
  func.func @transform_0(%arg0: i32) -> (i32, i32) {
    %c0_i32 = arith.constant 0 : i32
    %c0_i32_0 = arith.constant 0 : i32
    %c0_i32_1 = arith.constant 0 : i32
    return %c0_i32, %c0_i32_0 : i32, i32
  }
  func.func @transform_1(%arg0: i32) -> (i32, i32) {
    %c0_i32 = arith.constant 0 : i32
    %c0_i32_0 = arith.constant 0 : i32
    %c0_i32_1 = arith.constant 0 : i32
    return %c0_i32, %c0_i32_0 : i32, i32
  }
  func.func @transform_2(%arg0: i32) -> (i32, i32) {
    %c0_i32 = arith.constant 0 : i32
    %c0_i32_0 = arith.constant 0 : i32
    %c0_i32_1 = arith.constant 0 : i32
    return %c0_i32, %c0_i32_0 : i32, i32
  }
  func.func @transform_3(%arg0: i32) -> (i32, i32) {
    %c0_i32 = arith.constant 0 : i32
    %c0_i32_0 = arith.constant 0 : i32
    %c0_i32_1 = arith.constant 0 : i32
    return %c0_i32, %c0_i32_0 : i32, i32
  }
  func.func @transform_4(%arg0: i32) -> (i32, i32) {
    %c0_i32 = arith.constant 0 : i32
    %c0_i32_0 = arith.constant 0 : i32
    %c0_i32_1 = arith.constant 0 : i32
    return %c0_i32, %c0_i32_0 : i32, i32
  }
  func.func @transform_5(%arg0: i32) -> (i32, i32) {
    %c0_i32 = arith.constant 0 : i32
    %c0_i32_0 = arith.constant 0 : i32
    %c0_i32_1 = arith.constant 0 : i32
    return %c0_i32, %c0_i32_0 : i32, i32
  }
  func.func @transform_6(%arg0: i32) -> (i32, i32) {
    %c0_i32 = arith.constant 0 : i32
    %c0_i32_0 = arith.constant 0 : i32
    %c0_i32_1 = arith.constant 0 : i32
    return %c0_i32, %c0_i32_0 : i32, i32
  }
  func.func @transform_7(%arg0: i32) -> (i32, i32) {
    %c0_i32 = arith.constant 0 : i32
    %c0_i32_0 = arith.constant 0 : i32
    %c0_i32_1 = arith.constant 0 : i32
    return %c0_i32, %c0_i32_0 : i32, i32
  }
}

</mosaic_0001>

<bundles_post_ra>
// kernel: mul.3
= control target key start
LH: loop header
LB: loop body
LE: loop exit
PB: predicated region body
PF: predicated region fallthrough
CT: control target
= control target key end

     0   :  { %s34_s0 = inlined_call_operand.vmem [shape: f32[48], index: 0, kind: input, shape index: {}]   ;;  %s35_s1 = inlined_call_operand.vmem [shape: f32[48], index: 1, kind: input, shape index: {}]   ;;  %s36_s2 = inlined_call_operand.vmem [shape: f32[48], index: 2, kind: output, shape index: {}]  }
   0x1   :  { %v3_v0 = vld [vmem:[%s34_s0] sm:$0x1] }
   0x2   :  { %v4_v1 = vld [vmem:[%s35_s1] sm:$0x1] }
   0x3   :  { %v7_v2 = vmul.f32 %v4_v1, %v3_v0 }
   0x5   :  { %9 = vst [vmem:[%s36_s2] sm:$0x1] %v7_v2 }

// kernel: arma_forward.1
= control target key start
LH: loop header
LB: loop body
LE: loop exit
PB: predicated region body
PF: predicated region fallthrough
CT: control target
= control target key end

     0   :  { %s867_s0 = inlined_call_operand.vmem [shape: f32[16,128], index: 0, kind: input, shape index: {}]   ;;  %s868_s1 = inlined_call_operand.vmem [shape: bf16[16,16], index: 1, kind: input, shape index: {}]   ;;  %s869_s2 = inlined_call_operand.vmem [shape: bf16[16,16], index: 2, kind: input, shape index: {}]   ;;  %s870_s3 = inlined_call_operand.vmem [shape: bf16[128,256], index: 3, kind: input, shape index: {}]   ;;  %s871_s4 = inlined_call_operand.vmem [shape: bf16[128,256], index: 4, kind: input, shape index: {}]   ;;  %s872_s5 = inlined_call_operand.vmem [shape: f32[1,128], index: 5, kind: input, shape index: {}]   ;;  %s873_s6 = inlined_call_operand.vmem [shape: f32[1,128], index: 6, kind: input, shape index: {}]   ;;  %s874_s7 = inlined_call_operand.hbm [shape: f32[16,128], index: 7, kind: output, shape index: {}]  }
   0x1   :  { %v452_v0 = vld [vmem:[%s870_s3 + $0x70] sm:$0xf]  ;;  %v547_v1 = vld [vmem:[%s870_s3 + $0x74] sm:$0xf0]  ;;  %v444_v2 = vld [vmem:[%s870_s3 + $0x60] sm:$0xf] }
   0x2   :  { %v453_v3 = vor.u32 %v547_v1, %v452_v0  ;;  %v545_v4 = vld [vmem:[%s870_s3 + $0x64] sm:$0xf0]  ;;  %v436_v6 = vld [vmem:[%s870_s3 + $0x50] sm:$0xf]  ;;  %v543_v7 = vld [vmem:[%s870_s3 + $0x54] sm:$0xf0] }
   0x3   :  { %v445_v5 = vor.u32 %v545_v4, %v444_v2  ;;  %v546_v8 = vld [vmem:[%s870_s3 + $0x74] sm:$0xf]  ;;  %v454_v9 = vld [vmem:[%s870_s3 + $0x78] sm:$0xf0]  ;;  %v544_v10 = vld [vmem:[%s870_s3 + $0x64] sm:$0xf]  ;;  %v437_v11 = vor.u32 %v543_v7, %v436_v6 }
   0x4   :  { %127 = vmatpush.bf16.msra.mxu0 %v453_v3  ;;  %v457_v12 = vor.u32 %v546_v8, %v454_v9  ;;  %v446_v13 = vld [vmem:[%s870_s3 + $0x68] sm:$0xf0]  ;;  %v428_v14 = vld [vmem:[%s870_s3 + $0x40] sm:$0xf]  ;;  %v541_v15 = vld [vmem:[%s870_s3 + $0x44] sm:$0xf0] }
   0x5   :  { %v449_v16 = vor.u32 %v544_v10, %v446_v13  ;;  %v542_v17 = vld [vmem:[%s870_s3 + $0x54] sm:$0xf]  ;;  %v438_v18 = vld [vmem:[%s870_s3 + $0x58] sm:$0xf0] }
   0x6   :  { %141 = vmatpush.bf16.msra.mxu1 %v457_v12 }
   0x8   :  { %128 = vmatpush.bf16.msra.mxu0 %v445_v5 }
   0x9   :  { %12 = vsyncpa [#allocation3], 0  ;;  %v429_v19 = vor.u32 %v541_v15, %v428_v14  ;;  %v420_v20 = vld [vmem:[%s870_s3 + $0x30] sm:$0xf]  ;;  %v539_v21 = vld [vmem:[%s870_s3 + $0x34] sm:$0xf0]  ;;  %v441_v22 = vor.u32 %v542_v17, %v438_v18 }
   0xa   :  { %142 = vmatpush.bf16.msra.mxu1 %v449_v16  ;;  %v540_v23 = vld [vmem:[%s870_s3 + $0x44] sm:$0xf]  ;;  %v430_v24 = vld [vmem:[%s870_s3 + $0x48] sm:$0xf0]  ;;  %v421_v25 = vor.u32 %v539_v21, %v420_v20  ;;  %v412_v26 = vld [vmem:[%s870_s3 + $0x20] sm:$0xf] }
   0xb   :  { %v537_v27 = vld [vmem:[%s870_s3 + $0x24] sm:$0xf0]  ;;  %v433_v28 = vor.u32 %v540_v23, %v430_v24  ;;  %v538_v29 = vld [vmem:[%s870_s3 + $0x34] sm:$0xf]  ;;  %v422_v30 = vld [vmem:[%s870_s3 + $0x38] sm:$0xf0] }
   0xc   :  { %129 = vmatpush.bf16.msra.mxu0 %v437_v11  ;;  %v413_v31 = vor.u32 %v537_v27, %v412_v26  ;;  %v404_v32 = vld [vmem:[%s870_s3 + $0x10] sm:$0xf]  ;;  %v535_v33 = vld [vmem:[%s870_s3 + $0x14] sm:$0xf0]  ;;  %v425_v34 = vor.u32 %v538_v29, %v422_v30  ;;  %v396_v36 = vld [vmem:[%s870_s3] sm:$0xf] }
   0xd   :  { %v405_v35 = vor.u32 %v535_v33, %v404_v32  ;;  %v533_v37 = vld [vmem:[%s870_s3 + $0x4] sm:$0xf0]  ;;  %v28_v39 = vld [vmem:[%s867_s0] sm:$0xff]  ;;  %v414_v43 = vld [vmem:[%s870_s3 + $0x28] sm:$0xf0]  ;;  %vm163_vm0 = vcmask 130048  }
   0xe   :  { %143 = vmatpush.bf16.msra.mxu1 %v441_v22  ;;  %v397_v38 = vor.u32 %v533_v37, %v396_v36  ;;  %v29_v40 = vld [vmem:[%s867_s0 + $0x8] sm:$0xff]  ;;  %v536_v42 = vld [vmem:[%s870_s3 + $0x24] sm:$0xf]  ;;  %v534_v45 = vld [vmem:[%s870_s3 + $0x14] sm:$0xf]  ;;  %s382_s18 = sshll.u32 %s874_s7, 4  ;;  %s383_s18 = int_to_ptr.hbm [resolvable:$true] %s382_s18 }
   0xf   :  { %v46_v41 = vpack.c.bf16 %v29_v40, %v28_v39  ;;  %v417_v44 = vor.u32 %v536_v42, %v414_v43  ;;  %v406_v46 = vld [vmem:[%s870_s3 + $0x18] sm:$0xf0]  ;;  %v532_v48 = vld [vmem:[%s870_s3 + $0x4] sm:$0xf]  ;;  %v398_v49 = vld [vmem:[%s870_s3 + $0x8] sm:$0xf0] }
  0x10   :  { %130 = vmatpush.bf16.msra.mxu0 %v429_v19  ;;  %v409_v47 = vor.u32 %v534_v45, %v406_v46  ;;  %v401_v50 = vor.u32 %v532_v48, %v398_v49  ;;  %v521_v51 = vld [vmem:[%s871_s4 + $0x70] sm:$0xf]  ;;  %v564_v52 = vld [vmem:[%s871_s4 + $0x74] sm:$0xf0]  ;;  %v513_v54 = vld [vmem:[%s871_s4 + $0x60] sm:$0xf] }
  0x11   :  { %v522_v53 = vor.u32 %v564_v52, %v521_v51  ;;  %v562_v55 = vld [vmem:[%s871_s4 + $0x64] sm:$0xf0]  ;;  %v563_v58 = vld [vmem:[%s871_s4 + $0x74] sm:$0xf]  ;;  %v523_v59 = vld [vmem:[%s871_s4 + $0x78] sm:$0xf0] }
  0x12   :  { %144 = vmatpush.bf16.msra.mxu1 %v433_v28  ;;  %v514_v56 = vor.u32 %v562_v55, %v513_v54  ;;  %v526_v61 = vor.u32 %v563_v58, %v523_v59  ;;  %v561_v63 = vld [vmem:[%s871_s4 + $0x64] sm:$0xf]  ;;  %v515_v0 = vld [vmem:[%s871_s4 + $0x68] sm:$0xf0]  ;;  %v505_v3 = vld [vmem:[%s871_s4 + $0x50] sm:$0xf]  ;;  %v347_v55 = vlaneseq }
  0x13   :  { %286 = vmatpush.bf16.msra.mxu3 %v522_v53  ;;  %v548_v1 = vld [vmem:[%s868_s1] sm:$0xff]  ;;  %v518_v2 = vor.u32 %v561_v63, %v515_v0  ;;  %v560_v4 = vld [vmem:[%s871_s4 + $0x54] sm:$0xf0]  ;;  %v559_v5 = vld [vmem:[%s871_s4 + $0x54] sm:$0xf]  ;;  %s606_s0 = smov 128  }
  0x14   :  { %131 = vmatpush.bf16.msra.mxu0 %v421_v25  ;;  %v506_v6 = vor.u32 %v560_v4, %v505_v3  ;;  %v507_v7 = vld [vmem:[%s871_s4 + $0x58] sm:$0xf0]  ;;  %v497_v8 = vld [vmem:[%s871_s4 + $0x40] sm:$0xf]  ;;  %v558_v9 = vld [vmem:[%s871_s4 + $0x44] sm:$0xf0] }
  0x15   :  { %v510_v10 = vor.u32 %v559_v5, %v507_v7  ;;  %v557_v11 = vld [vmem:[%s871_s4 + $0x44] sm:$0xf]  ;;  %v499_v12 = vld [vmem:[%s871_s4 + $0x48] sm:$0xf0]  ;;  %v498_v13 = vor.u32 %v558_v9, %v497_v8  ;;  %v489_v15 = vld [vmem:[%s871_s4 + $0x30] sm:$0xf] }
  0x16   :  { %145 = vmatpush.bf16.msra.mxu1 %v425_v34  ;;  %v502_v14 = vor.u32 %v557_v11, %v499_v12  ;;  %v556_v16 = vld [vmem:[%s871_s4 + $0x34] sm:$0xf0]  ;;  %v555_v17 = vld [vmem:[%s871_s4 + $0x34] sm:$0xf]  ;;  %v491_v19 = vld [vmem:[%s871_s4 + $0x38] sm:$0xf0] }
  0x17   :  { %287 = vmatpush.bf16.msra.mxu3 %v514_v56  ;;  %v490_v18 = vor.u32 %v556_v16, %v489_v15  ;;  %v494_v20 = vor.u32 %v555_v17, %v491_v19  ;;  %v481_v21 = vld [vmem:[%s871_s4 + $0x20] sm:$0xf]  ;;  %v554_v22 = vld [vmem:[%s871_s4 + $0x24] sm:$0xf0]  ;;  %v553_v23 = vld [vmem:[%s871_s4 + $0x24] sm:$0xf] }
  0x18   :  { %132 = vmatpush.bf16.msra.mxu0 %v413_v31  ;;  %v482_v24 = vor.u32 %v554_v22, %v481_v21  ;;  %v483_v25 = vld [vmem:[%s871_s4 + $0x28] sm:$0xf0]  ;;  %v473_v27 = vld [vmem:[%s871_s4 + $0x10] sm:$0xf]  ;;  %v552_v28 = vld [vmem:[%s871_s4 + $0x14] sm:$0xf0] }
  0x19   :  { %v486_v26 = vor.u32 %v553_v23, %v483_v25  ;;  %v551_v29 = vld [vmem:[%s871_s4 + $0x14] sm:$0xf]  ;;  %v474_v30 = vor.u32 %v552_v28, %v473_v27  ;;  %v475_v31 = vld [vmem:[%s871_s4 + $0x18] sm:$0xf0]  ;;  %v465_v33 = vld [vmem:[%s871_s4] sm:$0xf] }
  0x1a   :  { %146 = vmatpush.bf16.msra.mxu1 %v417_v44  ;;  %v478_v32 = vor.u32 %v551_v29, %v475_v31  ;;  %v550_v34 = vld [vmem:[%s871_s4 + $0x4] sm:$0xf0]  ;;  %v467_v37 = vld [vmem:[%s871_s4 + $0x8] sm:$0xf0]  ;;  %v569_v42 = vld [vmem:[%s872_s5] ss:$0 sm:$0xff] }
  0x1b   :  { %288 = vmatpush.bf16.msra.mxu3 %v506_v6  ;;  %v466_v36 = vor.u32 %v550_v34, %v465_v33  ;;  %v565_v54 = vld [vmem:[%s869_s2] sm:$0xff]  ;;  %v348_v59 = vand.u32 127, %v347_v55  ;;  %s605_s2 = smov [#allocation2]   ;;  %s607_s19 = smov 8  }
  0x1c   :  { %133 = vmatpush.bf16.msra.mxu0 %v405_v35  ;;  %v549_v35 = vld [vmem:[%s871_s4 + $0x4] sm:$0xf] }
  0x1d   :  { %vm349_vm1 = vcmp.lt.s32.totalorder %v348_v59, 16 }
  0x1e   :  { %147 = vmatpush.bf16.msra.mxu1 %v409_v47 }
  0x1f   :  { %289 = vmatpush.bf16.msra.mxu3 %v498_v13 }
  0x20   :  { %134 = vmatpush.bf16.msra.mxu0 %v397_v38  ;;  %v470_v38 = vor.u32 %v549_v35, %v467_v37 }
  0x22   :  { %148 = vmatpush.bf16.msra.mxu1 %v401_v50 }
  0x23   :  { %135 = vmatmul.bf16.vlgmr.msra.gmra.mxu0 %v46_v41  ;;  %290 = vmatpush.bf16.msra.mxu3 %v490_v18 }
  0x25   :  { %149 = vmatmul.bf16.vlgmr.msra.gmra.mxu1 %v46_v41 }
  0x27   :  { %291 = vmatpush.bf16.msra.mxu3 %v482_v24 }
  0x2b   :  { %292 = vmatpush.bf16.msra.mxu3 %v474_v30 }
  0x2f   :  { %293 = vmatpush.bf16.msra.mxu3 %v466_v36 }
  0xa0   :  { %v136_v57 = vpop.f32.mrf.mxu0 }
  0xa2   :  { %v150_v39 = vpop.f32.mrf.mxu1 }
  0xa8   :  { %v138_v60 = vpop.f32.mrf.mxu0 }
  0xa9   :  { %v157_v62 = vpack.c.bf16 %v138_v60, %v136_v57  ;;  %v570_v57 = vld [vmem:[%s873_s6] ss:$0 sm:$0xff]  ;;  %s380_s6 = sshll.u32 %s605_s2, 4  ;;  %s381_s6 = int_to_ptr.vmem [resolvable:$true] %s380_s6 }
  0xaa   :  { %v152_v43 = vpop.f32.mrf.mxu1 }
  0xab   :  { %174 = vmatpush.bf16.msra.mxu2 %v157_v62 }
  0xae   :  { %462 = vmatmul.msk.bf16.vlgmr.msra.gmra.mxu2 %vm163_vm0, %v548_v1 }
  0xaf   :  { %300 = vmatpush.bf16.msrb.mxu2 %v526_v61 }
  0xb3   :  { %301 = vmatpush.bf16.msrb.mxu2 %v518_v2 }
  0xb7   :  { %302 = vmatpush.bf16.msrb.mxu2 %v510_v10 }
  0xbb   :  { %303 = vmatpush.bf16.msrb.mxu2 %v502_v14 }
  0xbf   :  { %304 = vmatpush.bf16.msrb.mxu2 %v494_v20 }
  0xc3   :  { %305 = vmatpush.bf16.msrb.mxu2 %v486_v26 }
  0xc7   :  { %306 = vmatpush.bf16.msrb.mxu2 %v478_v32 }
  0xcb   :  { %307 = vmatpush.bf16.msrb.mxu2 %v470_v38 }
 0x131   :  { %v176_v40 = vpop.f32.mrf.mxu2 }
 0x132   :  { %v177_v41 = vadd.f32 %v176_v40, %v150_v39 }
 0x134   :  { %v185_v45 = vadd.f32 %v569_v42, %v177_v41 }
 0x136   :  { %v187_v48 = vmax.f32 %v185_v45, 0.0 }
 0x139   :  { %v178_v44 = vpop.f32.mrf.mxu2 }
 0x13a   :  { %v179_v46 = vadd.f32 %v178_v44, %v152_v43 }
 0x13c   :  { %v186_v47 = vadd.f32 %v569_v42, %v179_v46 }
 0x13e   :  { %v188_v49 = vmax.f32 %v186_v47, 0.0 }
 0x140   :  { %v205_v50 = vpack.c.bf16 %v188_v49, %v187_v48 }
 0x142   :  { %294 = vmatmul.bf16.vlgmr.msra.gmra.mxu3 %v205_v50  ;;  %308 = vmatmul.bf16.vlgmr.msrb.gmra.mxu2 %v205_v50 }
 0x1c5   :  { %v295_v51 = vpop.f32.mrf.mxu3  ;;  %v309_v56 = vpop.f32.mrf.mxu2 }
 0x1cd   :  { %v297_v52 = vpop.f32.mrf.mxu3  ;;  %v311_v0 = vpop.f32.mrf.mxu2 }
 0x1ce   :  { %v316_v53 = vpack.c.bf16 %v297_v52, %v295_v51 }
 0x1d0   :  { %332 = vmatpush.bf16.msrb.mxu0 %v316_v53 }
 0x1d3   :  { %531 = vmatmul.msk.bf16.vlgmr.msrb.gmra.mxu0 %vm163_vm0, %v565_v54 }
 0x250   :  { %v334_v58 = vpop.f32.mrf.mxu0 }
 0x251   :  { %v335_v60 = vadd.f32 %v334_v58, %v309_v56 }
 0x253   :  { %v343_v61 = vadd.f32 %v570_v57, %v335_v60 }
 0x255   :  { %v345_v62 = vmax.f32 %v343_v61, 0.0 }
 0x257   :  { %v350_v63 = vsel %vm349_vm1, %v345_v62, -1e+30 }
 0x258   :  { %v336_v1 = vpop.f32.mrf.mxu0  ;;  %352 = vmax.xlane.f32.xlu0 %v350_v63 }
 0x259   :  { %v337_v2 = vadd.f32 %v336_v1, %v311_v0 }
 0x25b   :  { %v344_v3 = vadd.f32 %v570_v57, %v337_v2 }
 0x25d   :  { %v346_v4 = vmax.f32 %v344_v3, 0.0 }
 0x25f   :  { %v351_v5 = vsel %vm349_vm1, %v346_v4, -1e+30 }
 0x260   :  { %354 = vmax.xlane.f32.xlu0 %v351_v5 }
 0x2cb   :  { %v353_v6 = vpop.xlane.xlu0 %352 }
 0x2cc   :  { %v356_v7 = vsub.f32 %v350_v63, %v353_v6 }
 0x2ce   :  { %v358_v8 = vmul.f32 1.442695, %v356_v7 }
 0x2d0   :  { %571 = vpow2.f32 %v358_v8 }
 0x2d3   :  { %v355_v9 = vpop.xlane.xlu0 %354 }
 0x2d4   :  { %v357_v10 = vsub.f32 %v351_v5, %v355_v9 }
 0x2d6   :  { %v572_v11 = vpop.eup %571  ;;  %v360_v12 = vmul.f32 1.442695, %v357_v10 }
 0x2d7   :  { %v362_v13 = vsel %vm349_vm1, %v572_v11, 0.0 }
 0x2d8   :  { %573 = vpow2.f32 %v360_v12  ;;  %364 = vadd.xlane.f32.xlu1 %v362_v13 }
 0x2de   :  { %v574_v14 = vpop.eup %573 }
 0x2df   :  { %v363_v15 = vsel %vm349_vm1, %v574_v14, 0.0 }
 0x2e0   :  { %366 = vadd.xlane.f32.xlu1 %v363_v15 }
 0x34b   :  { %v365_v16 = vpop.xlane.xlu1 %364 }
 0x34c   :  { %575 = vlog2.f32 %v365_v16 }
 0x352   :  { %v576_v17 = vpop.eup %575 }
 0x353   :  { %v369_v18 = vmul.f32 0.6931472, %v576_v17  ;;  %v367_v19 = vpop.xlane.xlu1 %366 }
 0x354   :  { %577 = vlog2.f32 %v367_v19 }
 0x355   :  { %v372_v20 = vsub.f32 %v356_v7, %v369_v18 }
 0x357   :  { %374 = vst [vmem:[#allocation2] sm:$0xff] %v372_v20 }
 0x35a   :  { %v578_v21 = vpop.eup %577 }
 0x35b   :  { %v371_v22 = vmul.f32 0.6931472, %v578_v21 }
 0x35d   :  { %v373_v23 = vsub.f32 %v357_v10, %v371_v22 }
 0x35f   :  { %375 = vst [vmem:[#allocation2 + $0x8] sm:$0xff] %v373_v23 }
 0x360   :  { %388 = dma.vmem_to_hbm [thread:$0]  %s381_s6, 256, %s383_s18, [#allocation3], %s606_s0, %s606_s0, %s607_s19  }
 0x361   :  { %603 = dma.done.wait [#allocation3], 256  }
 0x362   :  { %604 = vsyncadd [#allocation3], 4294967040 }
 0x363   :  { %393 = vsyncpa [#allocation3], 1 }

</bundles_post_ra>
